<compile_context>
chip_gen: v5e
topology: v5e:2x2
jax: 0.10.0
libtpu: 0.0.40
codegen_flags: <defaults>
</compile_context>

<pallas_src>
import functools

import jax
import jax.numpy as jnp
from jax import lax
from jax.experimental import pallas as pl
from jax.experimental.pallas import tpu as pltpu

LANE = 128            # TPU lane width (last-dim alignment target)
LARGE_TILE_N = 1024   # batch-tile rows when N is large (sweep 512-2048)
SINGLE_TILE_MAX_N = 2048  # up to this many rows, run the whole batch as one tile


def _round_up(x, m):
    return ((x + m - 1) // m) * m


def mlp_kernel(x_ref, w1_ref, b1_ref, w2_ref, b2_ref, o_ref):
    """Fused Linear -> ReLU -> Linear on one (tile_n, D_in) row tile.

    x_ref  : (tile_n, D_in)  input rows
    w1_ref : (D_in, Hp)      layer-1 weights, [in, hidden] layout, hidden padded to 128
    b1_ref : (1, Hp)         layer-1 bias (padded)
    w2_ref : (1, Hp)         layer-2 weight row, [out, hidden] layout (padded)
    b2_ref : (1,)  SMEM      layer-2 bias scalar
    o_ref  : (1, tile_n)     batch-major, lane-dense output slab
    """
    h = jnp.dot(x_ref[...], w1_ref[...], preferred_element_type=jnp.float32)
    h = jnp.maximum(h + b1_ref[...], 0.0)                       # nn.ReLU
    # Layer 2: contract the hidden dim of h against the single w2 row so the
    # result is batch-major (1, tile_n) — a full, unmasked 128-lane store.
    y = lax.dot_general(w2_ref[...].astype(jnp.float32), h,
                        dimension_numbers=(((1,), (1,)), ((), ())),
                        preferred_element_type=jnp.float32)
    o_ref[...] = (y + b2_ref[0]).astype(o_ref.dtype)


def prepare_params(w1, b1, w2, b2, dtype=jnp.float32):
    """One-time parameter prep (NOT per forward call).

    Transposes layer 1 to [in, hidden] layout and zero-pads the hidden dim up
    to the 128-lane width so every operand is (8,128)-aligned.  Zero padding is
    exact: padded hidden columns give ReLU(0+0)=0 and the corresponding w2
    entries are 0, so real outputs are unchanged.  The output feature dim is
    NOT padded anymore — layer 2 emits a batch-major slab instead.

    dtype: jnp.float32 (default; required for v5e) or jnp.bfloat16 on v6e/v7x
    to halve x/weight DMA bytes (dots still accumulate in f32).
    """
    H, D_in = w1.shape
    D_out = w2.shape[0]
    assert D_out == 1, "final nn.Linear(*layer_shapes[-1]) has a single output"
    Hp = _round_up(max(H, LANE), LANE)

    w1_t = jnp.zeros((D_in, Hp), dtype).at[:, :H].set(w1.T.astype(dtype))
    b1_p = jnp.zeros((1, Hp), dtype).at[:, :H].set(b1.astype(dtype))
    w2_r = jnp.zeros((1, Hp), dtype).at[:, :H].set(w2.astype(dtype))   # [out, hidden]
    b2_s = b2.astype(jnp.float32).reshape((1,))                        # SMEM scalar
    return w1_t, b1_p, w2_r, b2_s


@functools.partial(jax.jit, static_argnames=("tile_n",))
def simple_network_forward(x, w1_t, b1_p, w2_r, b2_s, *, tile_n=None):
    """x: [N, D_in].  Params already prepared (transposed + hidden-padded)."""
    N, D_in = x.shape
    Hp = w1_t.shape[1]
    compute_dtype = w1_t.dtype
    x = x.astype(compute_dtype)

    # Adaptive batch tiling: one grid step for small N (per-step overhead
    # dominates), 1024-row tiles (sweep 512-2048) at scale.
    if tile_n is None:
        tile_n = (_round_up(max(N, LANE), LANE)
                  if N <= SINGLE_TILE_MAX_N else LARGE_TILE_N)
    assert tile_n % LANE == 0, "tile_n must be a multiple of 128 (lane-dense output)"

    # Pad batch up to a whole number of tiles (fused inside this jit).
    Np = _round_up(max(N, tile_n), tile_n)
    if Np != N:
        x = jnp.pad(x, ((0, Np - N), (0, 0)))

    grid = (Np // tile_n,)
    # Only shard across TensorCores (v7x megacore) when there are several tiles.
    semantics = ("parallel",) if grid[0] > 1 else ("arbitrary",)

    itemsize = jnp.dtype(compute_dtype).itemsize
    flops = 2 * Np * Hp * (D_in + 1)
    bytes_accessed = (itemsize * (Np * D_in + D_in * Hp + Hp + Hp)
                      + 4 * (1 + Np))

    y_pad = pl.pallas_call(
        mlp_kernel,
        out_shape=jax.ShapeDtypeStruct((1, Np), jnp.float32),
        grid=grid,
        in_specs=[
            pl.BlockSpec((tile_n, D_in), lambda i: (i, 0)),   # batch-tiled input
            pl.BlockSpec((D_in, Hp), lambda i: (0, 0)),       # VMEM-resident weights
            pl.BlockSpec((1, Hp), lambda i: (0, 0)),
            pl.BlockSpec((1, Hp), lambda i: (0, 0)),
            pl.BlockSpec(memory_space=pltpu.MemorySpace.SMEM),  # b2 scalar
        ],
        out_specs=pl.BlockSpec((1, tile_n), lambda i: (0, i)),  # lane-dense slab
        compiler_params=pltpu.CompilerParams(dimension_semantics=semantics),
        cost_estimate=pl.CostEstimate(
            flops=flops, transcendentals=0, bytes_accessed=bytes_accessed),
    )(x, w1_t, b1_p, w2_r, b2_s)

    # Drop padded batch entries and restore [N, 1] (fused inside the same jit).
    return y_pad[0, :N].reshape(N, 1)


def _init_linear(key, out_features, in_features):
    """Deterministic init mimicking torch.nn.Linear default (uniform +/- 1/sqrt(fan_in))."""
    kw, kb = jax.random.split(key)
    bound = 1.0 / jnp.sqrt(jnp.float32(in_features))
    w = jax.random.uniform(kw, (out_features, in_features), jnp.float32,
                           minval=-bound, maxval=bound)
    b = jax.random.uniform(kb, (out_features,), jnp.float32,
                           minval=-bound, maxval=bound)
    return w, b


if __name__ == "__main__":
    # Shapes consistent with the module: in=16, hidden=32, out=1; batch=256.
    N, D_IN, HID, D_OUT = 256, 16, 32, 1

    key = jax.random.PRNGKey(0)
    kx, k1, k2 = jax.random.split(key, 3)

    x = jax.random.normal(kx, (N, D_IN), dtype=jnp.float32)
    w1, b1 = _init_linear(k1, HID, D_IN)    # nn.Linear(16, 32)
    w2, b2 = _init_linear(k2, D_OUT, HID)   # final nn.Linear(32, 1)

    # One-time parameter prep (transpose + hidden-lane padding) -- outside the hot path.
    params = prepare_params(w1, b1, w2, b2, dtype=jnp.float32)
    params = jax.block_until_ready(params)

    y = simple_network_forward(x, *params)
    y = jax.block_until_ready(y)

    # Pure-JAX reference (original un-padded parameters).
    ref = jnp.maximum(x @ w1.T + b1, 0.0) @ w2.T + b2
    assert y.shape == (N, D_OUT)
    assert jnp.allclose(y, ref, atol=1e-5, rtol=1e-5)

    # TODO(synk): training loop (run_net: SGD/MSELoss/pearsonr), input/output
    # regularization helpers, and Qt signal plumbing are host-side orchestration,
    # not part of the forward kernel.
    print("KERNEL_OK")
</pallas_src>

<mosaic_0001>
module attributes {stable_mosaic.version = 11 : i64} {
  func.func @mlp_kernel(%arg0: i32, %arg1: memref<256x16xf32, #tpu.memory_space<vmem>>, %arg2: memref<16x128xf32, #tpu.memory_space<vmem>>, %arg3: memref<1x128xf32, #tpu.memory_space<vmem>>, %arg4: memref<1x128xf32, #tpu.memory_space<vmem>>, %arg5: memref<1xf32, #tpu.memory_space<smem>>, %arg6: memref<1x256xf32, #tpu.memory_space<vmem>>) attributes {dimension_semantics = [#tpu.dimension_semantics<arbitrary>], iteration_bounds = array<i64: 1>, scalar_prefetch = 0 : i64, scratch_operands = 0 : i64, tpu.core_type = #tpu.core_type<tc>, window_params = [{transform_indices = @transform_0, window_bounds = array<i64: 256, 16>}, {pipeline_mode = #tpu.pipeline_mode<synchronous>, transform_indices = @transform_1, window_bounds = array<i64: 16, 128>}, {pipeline_mode = #tpu.pipeline_mode<synchronous>, transform_indices = @transform_2, window_bounds = array<i64: 1, 128>}, {pipeline_mode = #tpu.pipeline_mode<synchronous>, transform_indices = @transform_3, window_bounds = array<i64: 1, 128>}, {transform_indices = @transform_4, window_bounds = array<i64: 1>}, {transform_indices = @transform_5, window_bounds = array<i64: 1, 256>}]} {
    %c0 = arith.constant 0 : index
    %c0_0 = arith.constant 0 : index
    %0 = vector.load %arg1[%c0, %c0_0] : memref<256x16xf32, #tpu.memory_space<vmem>>, vector<256x16xf32>
    %c0_1 = arith.constant 0 : index
    %c0_2 = arith.constant 0 : index
    %1 = vector.load %arg2[%c0_1, %c0_2] : memref<16x128xf32, #tpu.memory_space<vmem>>, vector<16x128xf32>
    %cst = arith.constant dense<0.000000e+00> : vector<256x128xf32>
    %2 = tpu.matmul %0, %1, %cst {dimension_numbers = #tpu.dot_dimension_numbers<[1], [0], [0], [1], [0, 0, 1, 1], [], []>} : vector<256x16xf32>, vector<16x128xf32>, vector<256x128xf32> -> vector<256x128xf32>
    %c0_3 = arith.constant 0 : index
    %c0_4 = arith.constant 0 : index
    %3 = vector.load %arg3[%c0_3, %c0_4] : memref<1x128xf32, #tpu.memory_space<vmem>>, vector<1x128xf32>
    %4 = vector.broadcast %3 : vector<1x128xf32> to vector<256x128xf32>
    %5 = arith.addf %2, %4 : vector<256x128xf32>
    %cst_5 = arith.constant 0.000000e+00 : f32
    %6 = vector.broadcast %cst_5 : f32 to vector<256x128xf32>
    %7 = arith.maximumf %5, %6 : vector<256x128xf32>
    %c0_6 = arith.constant 0 : index
    %c0_7 = arith.constant 0 : index
    %8 = vector.load %arg4[%c0_6, %c0_7] : memref<1x128xf32, #tpu.memory_space<vmem>>, vector<1x128xf32>
    %cst_8 = arith.constant dense<0.000000e+00> : vector<1x256xf32>
    %9 = tpu.matmul %8, %7, %cst_8 {dimension_numbers = #tpu.dot_dimension_numbers<[1], [1], [0], [0], [0, 0, 1, 0], [], []>} : vector<1x128xf32>, vector<256x128xf32>, vector<1x256xf32> -> vector<1x256xf32>
    %c0_9 = arith.constant 0 : index
    %10 = memref.load %arg5[%c0_9] : memref<1xf32, #tpu.memory_space<smem>>
    %11 = vector.broadcast %10 : f32 to vector<1x256xf32>
    %12 = arith.addf %9, %11 : vector<1x256xf32>
    %c0_10 = arith.constant 0 : index
    %c0_11 = arith.constant 0 : index
    %13 = vector.load %arg6[%c0_10, %c0_11] : memref<1x256xf32, #tpu.memory_space<vmem>>, vector<1x256xf32>
    tpu.vector_store %arg6[%c0_10, %c0_11], %12 {strides = array<i32>} : memref<1x256xf32, #tpu.memory_space<vmem>>, vector<1x256xf32>,
    return
  }
  func.func @transform_0(%arg0: i32) -> (i32, i32) {
    %c0_i32 = arith.constant 0 : i32
    %c0_i32_0 = arith.constant 0 : i32
    return %arg0, %c0_i32 : i32, i32
  }
  func.func @transform_1(%arg0: i32) -> (i32, i32) {
    %c0_i32 = arith.constant 0 : i32
    %c0_i32_0 = arith.constant 0 : i32
    %c0_i32_1 = arith.constant 0 : i32
    return %c0_i32, %c0_i32_0 : i32, i32
  }
  func.func @transform_2(%arg0: i32) -> (i32, i32) {
    %c0_i32 = arith.constant 0 : i32
    %c0_i32_0 = arith.constant 0 : i32
    %c0_i32_1 = arith.constant 0 : i32
    return %c0_i32, %c0_i32_0 : i32, i32
  }
  func.func @transform_3(%arg0: i32) -> (i32, i32) {
    %c0_i32 = arith.constant 0 : i32
    %c0_i32_0 = arith.constant 0 : i32
    %c0_i32_1 = arith.constant 0 : i32
    return %c0_i32, %c0_i32_0 : i32, i32
  }
  func.func @transform_4(%arg0: i32) -> i32 {
    %c0_i32 = arith.constant 0 : i32
    %c0_i32_0 = arith.constant 0 : i32
    return %c0_i32 : i32
  }
  func.func @transform_5(%arg0: i32) -> (i32, i32) {
    %c0_i32 = arith.constant 0 : i32
    %c0_i32_0 = arith.constant 0 : i32
    return %c0_i32, %arg0 : i32, i32
  }
}

</mosaic_0001>

<bundles_post_ra>
// kernel: simple_network_forward.1
= control target key start
LH: loop header
LB: loop body
LE: loop exit
PB: predicated region body
PF: predicated region fallthrough
CT: control target
= control target key end

     0   :  { %vm60_vm0 = vcmask 130048   ;;  %s680_s0 = inlined_call_operand.vmem [shape: f32[256,16], index: 0, kind: input, shape index: {}]   ;;  %s681_s1 = inlined_call_operand.vmem [shape: f32[16,128], index: 1, kind: input, shape index: {}]   ;;  %s682_s2 = inlined_call_operand.vmem [shape: f32[1,128], index: 2, kind: input, shape index: {}]   ;;  %s683_s3 = inlined_call_operand.vmem [shape: f32[1,128], index: 3, kind: input, shape index: {}]   ;;  %s684_s4 = inlined_call_operand.<no memory space> [shape: f32[1], index: 4, kind: input, shape index: {}]   ;;  %s685_s5 = inlined_call_operand.hbm [shape: f32[1,256], index: 5, kind: output, shape index: {}]  }
   0x1   :  { %v55_v0 = vld [vmem:[%s681_s1 + $0x8] sm:$0xff]  ;;  %v54_v1 = vld [vmem:[%s681_s1] sm:$0xff] }
   0x2   :  { %171 = vmatpush.msra.mxu0 %v55_v0  ;;  %405 = vmatpush.msra.mxu3 %v55_v0  ;;  %v22_v2 = vld [vmem:[%s680_s0] sm:$0xff]  ;;  %v43_v3 = vld [vmem:[%s680_s0 + $0xa8] sm:$0xff] }
   0x3   :  { %404 = vmatpush.msra.mxu1 %v55_v0 }
   0x4   :  { %172 = vmatpush.msra.mxu0 %v54_v1  ;;  %407 = vmatpush.msra.mxu3 %v54_v1 }
   0x5   :  { %372 = vmatmul.msk.f32.vlgmr.msra.gmra.mxu0 %vm60_vm0, %v22_v2  ;;  %393 = vmatmul.msk.f32.vlgmr.msra.gmra.mxu3 %vm60_vm0, %v43_v3 }
   0x6   :  { %11 = vsyncpa [#allocation4], 0  ;;  %406 = vmatpush.msra.mxu1 %v54_v1  ;;  %v23_v4 = vld [vmem:[%s680_s0 + $0x8] sm:$0xff]  ;;  %v44_v5 = vld [vmem:[%s680_s0 + $0xb0] sm:$0xff]  ;;  %s436_s12 = smov [#allocation3]   ;;  %s363_s16 = sshll.u32 %s685_s5, 4  ;;  %s364_s16 = int_to_ptr.hbm [resolvable:$true] %s363_s16 }
   0x7   :  { %v24_v6 = vld [vmem:[%s680_s0 + $0x10] sm:$0xff]  ;;  %v45_v7 = vld [vmem:[%s680_s0 + $0xb8] sm:$0xff]  ;;  %v35_v8 = vld [vmem:[%s680_s0 + $0x68] sm:$0xff]  ;;  %s361_s13 = sshll.u32 %s436_s12, 4  ;;  %vm348_vm1 = vcmask 1040384   ;;  %s362_s13 = int_to_ptr.vmem [resolvable:$true] %s361_s13 }
   0x8   :  { %385 = vmatmul.msk.f32.vlgmr.msra.gmra.mxu1 %vm60_vm0, %v35_v8  ;;  %v25_v9 = vld [vmem:[%s680_s0 + $0x18] sm:$0xff]  ;;  %v46_v10 = vld [vmem:[%s680_s0 + $0xc0] sm:$0xff]  ;;  %v36_v11 = vld [vmem:[%s680_s0 + $0x70] sm:$0xff] }
   0x9   :  { %v26_v12 = vld [vmem:[%s680_s0 + $0x20] sm:$0xff]  ;;  %v47_v13 = vld [vmem:[%s680_s0 + $0xc8] sm:$0xff]  ;;  %v37_v14 = vld [vmem:[%s680_s0 + $0x78] sm:$0xff] }
   0xa   :  { %v27_v15 = vld [vmem:[%s680_s0 + $0x28] sm:$0xff]  ;;  %v48_v16 = vld [vmem:[%s680_s0 + $0xd0] sm:$0xff]  ;;  %v49_v18 = vld [vmem:[%s680_s0 + $0xd8] sm:$0xff] }
   0xb   :  { %v28_v17 = vld [vmem:[%s680_s0 + $0x30] sm:$0xff]  ;;  %v29_v19 = vld [vmem:[%s680_s0 + $0x38] sm:$0xff]  ;;  %v50_v20 = vld [vmem:[%s680_s0 + $0xe0] sm:$0xff] }
   0xc   :  { %v30_v21 = vld [vmem:[%s680_s0 + $0x40] sm:$0xff]  ;;  %v51_v22 = vld [vmem:[%s680_s0 + $0xe8] sm:$0xff]  ;;  %v52_v25 = vld [vmem:[%s680_s0 + $0xf0] sm:$0xff] }
   0xd   :  { %373 = vmatmul.msk.f32.gmra.mxu0 %vm60_vm0, %v23_v4  ;;  %394 = vmatmul.msk.f32.gmra.mxu3 %vm60_vm0, %v44_v5  ;;  %v38_v23 = vld [vmem:[%s680_s0 + $0x80] sm:$0xff]  ;;  %v31_v24 = vld [vmem:[%s680_s0 + $0x48] sm:$0xff]  ;;  %v32_v27 = vld [vmem:[%s680_s0 + $0x50] sm:$0xff] }
   0xe   :  { %v39_v26 = vld [vmem:[%s680_s0 + $0x88] sm:$0xff]  ;;  %v53_v28 = vld [vmem:[%s680_s0 + $0xf8] sm:$0xff]  ;;  %v40_v29 = vld [vmem:[%s680_s0 + $0x90] sm:$0xff] }
   0xf   :  { %v33_v30 = vld [vmem:[%s680_s0 + $0x58] sm:$0xff]  ;;  %v34_v32 = vld [vmem:[%s680_s0 + $0x60] sm:$0xff] }
  0x10   :  { %386 = vmatmul.msk.f32.gmra.mxu1 %vm60_vm0, %v36_v11  ;;  %v41_v31 = vld [vmem:[%s680_s0 + $0x98] sm:$0xff]  ;;  %v42_v33 = vld [vmem:[%s680_s0 + $0xa0] sm:$0xff] }
  0x11   :  { %v620_v45 = vld [vmem:[%s682_s2] ss:$0 sm:$0xff] }
  0x15   :  { %374 = vmatmul.msk.f32.gmra.mxu0 %vm60_vm0, %v24_v6  ;;  %395 = vmatmul.msk.f32.gmra.mxu3 %vm60_vm0, %v45_v7 }
  0x18   :  { %387 = vmatmul.msk.f32.gmra.mxu1 %vm60_vm0, %v37_v14 }
  0x1d   :  { %375 = vmatmul.msk.f32.gmra.mxu0 %vm60_vm0, %v25_v9  ;;  %396 = vmatmul.msk.f32.gmra.mxu3 %vm60_vm0, %v46_v10 }
  0x20   :  { %388 = vmatmul.msk.f32.gmra.mxu1 %vm60_vm0, %v38_v23 }
  0x25   :  { %376 = vmatmul.msk.f32.gmra.mxu0 %vm60_vm0, %v26_v12  ;;  %397 = vmatmul.msk.f32.gmra.mxu3 %vm60_vm0, %v47_v13 }
  0x28   :  { %389 = vmatmul.msk.f32.gmra.mxu1 %vm60_vm0, %v39_v26 }
  0x2d   :  { %377 = vmatmul.msk.f32.gmra.mxu0 %vm60_vm0, %v27_v15  ;;  %398 = vmatmul.msk.f32.gmra.mxu3 %vm60_vm0, %v48_v16 }
  0x30   :  { %390 = vmatmul.msk.f32.gmra.mxu1 %vm60_vm0, %v40_v29 }
  0x35   :  { %378 = vmatmul.msk.f32.gmra.mxu0 %vm60_vm0, %v28_v17  ;;  %399 = vmatmul.msk.f32.gmra.mxu3 %vm60_vm0, %v49_v18 }
  0x38   :  { %391 = vmatmul.msk.f32.gmra.mxu1 %vm60_vm0, %v41_v31 }
  0x3d   :  { %379 = vmatmul.msk.f32.gmra.mxu0 %vm60_vm0, %v29_v19  ;;  %400 = vmatmul.msk.f32.gmra.mxu3 %vm60_vm0, %v50_v20 }
  0x40   :  { %392 = vmatmul.msk.f32.gmra.mxu1 %vm60_vm0, %v42_v33 }
  0x45   :  { %380 = vmatmul.msk.f32.gmra.mxu0 %vm60_vm0, %v30_v21  ;;  %401 = vmatmul.msk.f32.gmra.mxu3 %vm60_vm0, %v51_v22 }
  0x4d   :  { %381 = vmatmul.msk.f32.gmra.mxu0 %vm60_vm0, %v31_v24  ;;  %402 = vmatmul.msk.f32.gmra.mxu3 %vm60_vm0, %v52_v25 }
  0x55   :  { %382 = vmatmul.msk.f32.gmra.mxu0 %vm60_vm0, %v32_v27  ;;  %403 = vmatmul.msk.f32.gmra.mxu3 %vm60_vm0, %v53_v28 }
  0x5d   :  { %383 = vmatmul.msk.f32.gmra.mxu0 %vm60_vm0, %v33_v30 }
  0x65   :  { %384 = vmatmul.msk.f32.gmra.mxu0 %vm60_vm0, %v34_v32 }
  0x82   :  { %v601_v34 = vpop.f32.mrf.mxu0 }
  0x85   :  { %v213_v39 = vpop.f32.mrf.mxu1 }
  0x86   :  { %v214_v51 = vadd.f32 %v620_v45, %v213_v39 }
  0x88   :  { %v603_v35 = vpop.f32.mrf.mxu3  ;;  %v283_v54 = vmax.f32 %v214_v51, 0.0 }
  0x8a   :  { %v605_v36 = vpop.f32.mrf.mxu0 }
  0x8d   :  { %v216_v42 = vpop.f32.mrf.mxu1 }
  0x8e   :  { %v217_v47 = vadd.f32 %v620_v45, %v216_v42 }
  0x90   :  { %v607_v37 = vpop.f32.mrf.mxu3  ;;  %v284_v52 = vmax.f32 %v217_v47, 0.0 }
  0x92   :  { %v609_v38 = vpop.f32.mrf.mxu0 }
  0x95   :  { %v219_v46 = vpop.f32.mrf.mxu1 }
  0x96   :  { %v220_v48 = vadd.f32 %v620_v45, %v219_v46 }
  0x98   :  { %v611_v40 = vpop.f32.mrf.mxu3  ;;  %v285_v49 = vmax.f32 %v220_v48, 0.0  ;;  %v241_v48 = vadd.f32 %v620_v45, %v607_v37 }
  0x99   :  { %v244_v39 = vadd.f32 %v620_v45, %v611_v40  ;;  %v238_v40 = vadd.f32 %v620_v45, %v603_v35  ;;  %v181_v35 = vadd.f32 %v620_v45, %v609_v38 }
  0x9a   :  { %v613_v41 = vpop.f32.mrf.mxu0  ;;  %305 = vmatpush.xpose.msrb.mxu1 %v285_v49 }
  0x9d   :  { %v627_v1 = vpop.f32.mrf.mxu1 }
  0x9e   :  { %306 = vmatpush.xpose.msrb.mxu1 %v284_v52  ;;  %v292_v52 = vmax.f32 %v241_v48, 0.0 }
  0xa0   :  { %v246_v43 = vpop.f32.mrf.mxu3 }
  0xa1   :  { %v247_v29 = vadd.f32 %v620_v45, %v246_v43  ;;  %v293_v43 = vmax.f32 %v244_v39, 0.0 }
  0xa2   :  { %v615_v44 = vpop.f32.mrf.mxu0  ;;  %307 = vmatpush.xpose.msrb.mxu1 %v283_v54 }
  0xa3   :  { %v294_v42 = vmax.f32 %v247_v29, 0.0  ;;  %v187_v54 = vadd.f32 %v620_v45, %v615_v44 }
  0xa5   :  { %v632_v9 = vpop.f32.mrf.mxu1 }
  0xa8   :  { %v249_v50 = vpop.f32.mrf.mxu3 }
  0xa9   :  { %v250_v25 = vadd.f32 %v620_v45, %v249_v50 }
  0xaa   :  { %v625_v53 = vpop.f32.mrf.mxu0 }
  0xab   :  { %v295_v30 = vmax.f32 %v250_v25, 0.0  ;;  %v190_v49 = vadd.f32 %v620_v45, %v625_v53  ;;  %v184_v53 = vadd.f32 %v620_v45, %v613_v41  ;;  %v226_v41 = vadd.f32 %v620_v45, %v632_v9 }
  0xad   :  { %v228_v20 = vpop.f32.mrf.mxu1 }
  0xae   :  { %v229_v44 = vadd.f32 %v620_v45, %v228_v20 }
  0xb0   :  { %v252_v55 = vpop.f32.mrf.mxu3 }
  0xb1   :  { %v253_v21 = vadd.f32 %v620_v45, %v252_v55  ;;  %v275_v55 = vmax.f32 %v190_v49, 0.0 }
  0xb2   :  { %v192_v56 = vpop.f32.mrf.mxu0 }
  0xb3   :  { %v296_v26 = vmax.f32 %v253_v21, 0.0  ;;  %v193_v46 = vadd.f32 %v620_v45, %v192_v56  ;;  %v291_v56 = vmax.f32 %v238_v40, 0.0 }
  0xb5   :  { %v231_v31 = vpop.f32.mrf.mxu1  ;;  %v276_v50 = vmax.f32 %v193_v46, 0.0 }
  0xb8   :  { %v255_v57 = vpop.f32.mrf.mxu3 }
  0xb9   :  { %v256_v16 = vadd.f32 %v620_v45, %v255_v57  ;;  %v274_v57 = vmax.f32 %v187_v54, 0.0 }
  0xba   :  { %v195_v58 = vpop.f32.mrf.mxu0 }
  0xbb   :  { %v297_v22 = vmax.f32 %v256_v16, 0.0  ;;  %v196_v32 = vadd.f32 %v620_v45, %v195_v58 }
  0xbd   :  { %v277_v47 = vmax.f32 %v196_v32, 0.0  ;;  %v234_v51 = vpop.f32.mrf.mxu1 }
  0xbe   :  { %v235_v37 = vadd.f32 %v620_v45, %v234_v51 }
  0xc0   :  { %v258_v59 = vpop.f32.mrf.mxu3  ;;  %v290_v58 = vmax.f32 %v235_v37, 0.0 }
  0xc1   :  { %v259_v11 = vadd.f32 %v620_v45, %v258_v59  ;;  %v232_v59 = vadd.f32 %v620_v45, %v231_v31 }
  0xc2   :  { %v198_v60 = vpop.f32.mrf.mxu0 }
  0xc3   :  { %v298_v17 = vmax.f32 %v259_v11, 0.0  ;;  %v199_v27 = vadd.f32 %v620_v45, %v198_v60  ;;  %v273_v60 = vmax.f32 %v184_v53, 0.0 }
  0xc5   :  { %v278_v33 = vmax.f32 %v199_v27, 0.0 }
  0xc8   :  { %v261_v61 = vpop.f32.mrf.mxu3 }
  0xc9   :  { %v262_v7 = vadd.f32 %v620_v45, %v261_v61  ;;  %v289_v61 = vmax.f32 %v232_v59, 0.0 }
  0xca   :  { %v201_v62 = vpop.f32.mrf.mxu0 }
  0xcb   :  { %v299_v12 = vmax.f32 %v262_v7, 0.0  ;;  %v202_v23 = vadd.f32 %v620_v45, %v201_v62  ;;  %v178_v62 = vadd.f32 %v620_v45, %v605_v36 }
  0xcd   :  { %v279_v28 = vmax.f32 %v202_v23, 0.0  ;;  %v271_v38 = vmax.f32 %v178_v62, 0.0 }
  0xd0   :  { %v264_v63 = vpop.f32.mrf.mxu3 }
  0xd1   :  { %v265_v5 = vadd.f32 %v620_v45, %v264_v63  ;;  %v272_v63 = vmax.f32 %v181_v35, 0.0 }
  0xd2   :  { %v204_v0 = vpop.f32.mrf.mxu0 }
  0xd3   :  { %v300_v8 = vmax.f32 %v265_v5, 0.0  ;;  %v205_v18 = vadd.f32 %v620_v45, %v204_v0  ;;  %v288_v0 = vmax.f32 %v229_v44, 0.0 }
  0xd5   :  { %v280_v24 = vmax.f32 %v205_v18, 0.0 }
  0xd8   :  { %v267_v2 = vpop.f32.mrf.mxu3 }
  0xd9   :  { %v268_v3 = vadd.f32 %v620_v45, %v267_v2  ;;  %v175_v2 = vadd.f32 %v620_v45, %v601_v34  ;;  %v304_v34 = vstv %s684_s4 }
  0xda   :  { %v207_v4 = vpop.f32.mrf.mxu0 }
  0xdb   :  { %v301_v6 = vmax.f32 %v268_v3, 0.0  ;;  %v208_v14 = vadd.f32 %v620_v45, %v207_v4  ;;  %v223_v3 = vadd.f32 %v620_v45, %v627_v1  ;;  %v287_v4 = vmax.f32 %v226_v41, 0.0 }
  0xdc   :  { %v270_v5 = vmax.f32 %v175_v2, 0.0 }
  0xdd   :  { %325 = vmatpush.xpose.msra.mxu2 %v301_v6  ;;  %v281_v19 = vmax.f32 %v208_v14, 0.0  ;;  %v286_v36 = vmax.f32 %v223_v3, 0.0  ;;  %v302_v6 = vld [vmem:[%s683_s3] sm:$0x1] }
  0xe1   :  { %326 = vmatpush.xpose.msra.mxu2 %v300_v8  ;;  %v351_v8 = vlaneseq }
  0xe2   :  { %v210_v10 = vpop.f32.mrf.mxu0 }
  0xe3   :  { %v211_v13 = vadd.f32 %v620_v45, %v210_v10  ;;  %vm353_vm2 = vcmp.lt.s32.totalorder %v351_v8, 256 }
  0xe5   :  { %v282_v15 = vmax.f32 %v211_v13, 0.0  ;;  %327 = vmatpush.xpose.msra.mxu2 %v299_v12 }
  0xe7   :  { %308 = vmatpush.xpose.msrb.mxu1 %v282_v15 }
  0xe9   :  { %328 = vmatpush.xpose.msra.mxu2 %v298_v17 }
  0xeb   :  { %309 = vmatpush.xpose.msrb.mxu1 %v281_v19 }
  0xed   :  { %329 = vmatpush.xpose.msra.mxu2 %v297_v22 }
  0xef   :  { %310 = vmatpush.xpose.msrb.mxu1 %v280_v24 }
  0xf1   :  { %330 = vmatpush.xpose.msra.mxu2 %v296_v26 }
  0xf3   :  { %311 = vmatpush.xpose.msrb.mxu1 %v279_v28 }
  0xf5   :  { %331 = vmatpush.xpose.msra.mxu2 %v295_v30 }
  0xf7   :  { %312 = vmatpush.xpose.msrb.mxu1 %v278_v33 }
  0xf9   :  { %332 = vmatpush.xpose.msra.mxu2 %v294_v42 }
  0xfb   :  { %313 = vmatpush.xpose.msrb.mxu1 %v277_v47 }
  0xfd   :  { %333 = vmatpush.xpose.msra.mxu2 %v293_v43 }
  0xff   :  { %314 = vmatpush.xpose.msrb.mxu1 %v276_v50 }
 0x101   :  { %334 = vmatpush.xpose.msra.mxu2 %v292_v52 }
 0x103   :  { %315 = vmatpush.xpose.msrb.mxu1 %v275_v55 }
 0x105   :  { %335 = vmatpush.xpose.msra.mxu2 %v291_v56 }
 0x107   :  { %316 = vmatpush.xpose.msrb.mxu1 %v274_v57 }
 0x109   :  { %336 = vmatpush.xpose.msra.mxu2 %v290_v58 }
 0x10b   :  { %317 = vmatpush.xpose.msrb.mxu1 %v273_v60 }
 0x10d   :  { %337 = vmatpush.xpose.msra.mxu2 %v289_v61 }
 0x10f   :  { %318 = vmatpush.xpose.msrb.mxu1 %v272_v63 }
 0x111   :  { %338 = vmatpush.xpose.msra.mxu2 %v288_v0 }
 0x113   :  { %319 = vmatpush.xpose.msrb.mxu1 %v271_v38 }
 0x115   :  { %339 = vmatpush.xpose.msra.mxu2 %v287_v4 }
 0x117   :  { %320 = vmatpush.xpose.msrb.mxu1 %v270_v5 }
 0x119   :  { %340 = vmatpush.xpose.msra.mxu2 %v286_v36 }
 0x11a   :  { %321 = vmatmul.f32.vlgmr.msrb.gmra.mxu1 %v302_v6 }
 0x11c   :  { %341 = vmatmul.f32.vlgmr.msra.gmra.mxu2 %v302_v6 }
 0x197   :  { %v322_v7 = vpop.f32.mrf.mxu1 }
 0x198   :  { %v323_v9 = vadd.f32 %v322_v7, %v304_v34 }
 0x19f   :  { %v342_v45 = vpop.f32.mrf.mxu2 }
 0x1a0   :  { %v343_v1 = vadd.f32 %v342_v45, %v304_v34 }
 0x1a2   :  { %v347_v10 = vrot.slane %v343_v1, 7 }
 0x1a4   :  { %v349_v11 = vsel %vm348_vm1, %v323_v9, %v347_v10 }
 0x1a5   :  { %355 = vst.msk [vmem:[#allocation3] sm:$0x3] %vm353_vm2, %v349_v11 }
 0x1a6   :  { %366 = dma.vmem_to_hbm [thread:$0]  %s362_s13, 32, %s364_s16, [#allocation4]  }
 0x1a7   :  { %434 = dma.done.wait [#allocation4], 32  }
 0x1a8   :  { %435 = vsyncadd [#allocation4], 4294967264 }
 0x1a9   :  { %371 = vsyncpa [#allocation4], 1 }

</bundles_post_ra>
